<compile_context>
chip_gen: v7x
topology: tpu7x:2x2x1
jax: 0.10.0
libtpu: 0.0.40
codegen_flags: <defaults>
</compile_context>

<pallas_src>
import math

import jax
import jax.numpy as jnp
from jax.experimental import pallas as pl
from jax.experimental.pallas import tpu as pltpu

# Rows of out1 materialized at once; bounds live VMEM to ~ ROW_CHUNK*num*4 B
# per chunk instead of num*num*4 B.  (For the test shapes, num=128, this is a
# single iteration identical to the direct computation.)
_ROW_CHUNK = 512


def it_kernel(x1t_ref, t1t_ref, w_ref, b_ref, o_ref):
    """One batch element per grid step; writes the per-batch partial
    -(sum log(out1_i) + sum log(out2_i)) broadcast over a (1,8,128) block."""
    x1t = x1t_ref[0]                                  # (K, num)  lane-dense
    t1t = t1t_ref[0]                                  # (M, num)  lane-dense
    num = x1t.shape[1]

    # Linear(K->M) in transposed orientation: x2^T = W @ x1^T + b
    # (plain A@B on the MXU, lane-dense (M, num) result).
    x2t = jnp.dot(w_ref[...], x1t,
                  preferred_element_type=jnp.float32) + b_ref[...]     # (M, num)

    # One tiny (M, num) -> (num, M) transpose so both bmms below contract the
    # natural MXU dims (last of lhs, first of rhs).
    x2 = x2t.T                                        # (num, M)

    # out2 = t1^T @ x2 : (M, num) @ (num, M) -> (M, M), contraction depth num.
    out2 = jnp.dot(t1t, x2, preferred_element_type=jnp.float32)
    acc = jnp.sum(jnp.log(out2))

    # out1 = x2 @ t1^T : (num, M) @ (M, num) -> (num, num), reduced to
    # sum(log(.)) row-chunk by row-chunk so the f32 intermediate never blows
    # up VMEM for large `num`.  (Static Python loop; single pass at num=128.)
    for r0 in range(0, num, _ROW_CHUNK):
        rows = min(_ROW_CHUNK, num - r0)
        blk = jnp.dot(x2[r0:r0 + rows, :], t1t,
                      preferred_element_type=jnp.float32)               # (rows, num)
        acc = acc + jnp.sum(jnp.log(blk))

    # Negate while storing; broadcast over the full lane-dense output block
    # (unmasked store).  Wrapper reads [:, 0, 0].
    o_ref[...] = jnp.full(o_ref.shape, -acc, dtype=o_ref.dtype)


def it_forward(x, t, weight, bias):
    b, c, h, w = x.shape
    b2, seq_len, h2 = t.shape
    assert b == b2
    num = math.gcd(c * h * w, seq_len * h2)
    K = c * h * w // num
    M = seq_len * h2 // num

    # One reshape + transpose in XLA (outside the kernel) so every kernel tile
    # is lane-dense with `num` as the last dim.
    x1t = jnp.swapaxes(x.reshape(b, num, K), 1, 2)    # (b, K, num)
    t1t = jnp.swapaxes(t.reshape(b, num, M), 1, 2)    # (b, M, num)
    b2d = bias.reshape(M, 1)                          # broadcast over lanes

    flops = b * (2 * num * K * M + 2 * num * num * M + 2 * M * M * num)
    transcendentals = b * (num * num + M * M)
    bytes_accessed = 4 * (x1t.size + t1t.size + weight.size + b2d.size
                          + b * 8 * 128)

    # Explicit scoped-VMEM budget: bounded row-chunked out1 + double-buffered
    # inputs/outputs + slack; clamped so it is safe on every generation
    # (v5e/v6e 128 MiB, v7x 64 MiB physical).
    est = 4 * (4 * min(num, _ROW_CHUNK) * num
               + 8 * (K + M + 2) * num + 4 * M * K + 4 * 8 * 128)
    vmem_limit = int(min(max(est + (4 << 20), 16 << 20), 48 << 20))

    partials = pl.pallas_call(
        it_kernel,
        out_shape=jax.ShapeDtypeStruct((b, 8, 128), jnp.float32),
        grid=(b,),
        in_specs=[
            pl.BlockSpec((1, K, num), lambda i: (i, 0, 0)),
            pl.BlockSpec((1, M, num), lambda i: (i, 0, 0)),
            pl.BlockSpec((M, K), lambda i: (0, 0)),
            pl.BlockSpec((M, 1), lambda i: (0, 0)),
        ],
        out_specs=pl.BlockSpec((1, 8, 128), lambda i: (i, 0, 0)),
        compiler_params=pltpu.CompilerParams(
            # No carried output dependence -> batch axis can be sharded across
            # TensorCores (pure win on v7x, neutral on v5e/v6e).
            dimension_semantics=("parallel",),
            vmem_limit_bytes=vmem_limit),
        cost_estimate=pl.CostEstimate(
            flops=flops,
            transcendentals=transcendentals,
            bytes_accessed=bytes_accessed),
    )(x1t, t1t, weight, b2d)

    # Per-batch partials are already negated; reduce to the module's scalar.
    return jnp.sum(partials[:, 0, 0])


def reference(x, t, weight, bias):
    """Pure-JAX mirror of the PyTorch forward pass."""
    b, c, h, w = x.shape
    _, seq_len, h2 = t.shape
    num = math.gcd(c * h * w, seq_len * h2)
    x1 = x.reshape(b, num, c * h * w // num)
    t1 = t.reshape(b, num, seq_len * h2 // num)
    x2 = x1 @ weight.T + bias
    t2 = jnp.swapaxes(t1, -1, -2)
    out1 = x2 @ t2
    out2 = t2 @ x2
    return -(jnp.sum(jnp.log(out1)) + jnp.sum(jnp.log(out2)))


if __name__ == "__main__":
    B, C, HH, WW = 2, 4, 16, 16          # c*h*w = 1024
    SEQ, H2 = 8, 48                      # seq*h2 = 384 ; gcd = 128 -> K=8, M=3

    key = jax.random.PRNGKey(0)
    kx, kt, kw, kb = jax.random.split(key, 4)

    # Strictly positive inputs / weights so log(out1), log(out2) stay finite
    # (the module implicitly assumes positive bmm results).
    x = jax.random.uniform(kx, (B, C, HH, WW), jnp.float32, minval=0.5, maxval=1.5)
    t = jax.random.uniform(kt, (B, SEQ, H2), jnp.float32, minval=0.5, maxval=1.5)

    num = math.gcd(C * HH * WW, SEQ * H2)
    K = C * HH * WW // num
    M = SEQ * H2 // num
    # TODO(synk): the PyTorch module re-creates nn.Linear with fresh random
    # weights on every forward; here the Linear params are explicit,
    # deterministic inputs instead.
    weight = jax.random.uniform(kw, (M, K), jnp.float32, minval=0.05, maxval=0.15)
    bias = jax.random.uniform(kb, (M,), jnp.float32, minval=0.05, maxval=0.15)

    out = jax.block_until_ready(it_forward(x, t, weight, bias))
    ref = jax.block_until_ready(reference(x, t, weight, bias))

    assert out.shape == ()
    assert jnp.isfinite(out)
    assert jnp.allclose(out, ref, rtol=1e-3, atol=1e-3), (float(out), float(ref))
    print("KERNEL_OK")
</pallas_src>

<mosaic_0001>
module attributes {stable_mosaic.version = 11 : i64} {
  func.func @it_kernel(%arg0: i32, %arg1: memref<1x8x128xf32, #tpu.memory_space<vmem>>, %arg2: memref<1x3x128xf32, #tpu.memory_space<vmem>>, %arg3: memref<3x8xf32, #tpu.memory_space<vmem>>, %arg4: memref<3x1xf32, #tpu.memory_space<vmem>>, %arg5: memref<1x8x128xf32, #tpu.memory_space<vmem>>) attributes {dimension_semantics = [#tpu.dimension_semantics<parallel>], iteration_bounds = array<i64: 2>, scalar_prefetch = 0 : i64, scratch_operands = 0 : i64, tpu.core_type = #tpu.core_type<tc>, window_params = [{transform_indices = @transform_0, window_bounds = array<i64: 1, 8, 128>}, {transform_indices = @transform_1, window_bounds = array<i64: 1, 3, 128>}, {pipeline_mode = #tpu.pipeline_mode<synchronous>, transform_indices = @transform_2, window_bounds = array<i64: 3, 8>}, {pipeline_mode = #tpu.pipeline_mode<synchronous>, transform_indices = @transform_3, window_bounds = array<i64: 3, 1>}, {transform_indices = @transform_4, window_bounds = array<i64: 1, 8, 128>}]} {
    %c0 = arith.constant 0 : index
    %c0_0 = arith.constant 0 : index
    %c0_1 = arith.constant 0 : index
    %0 = vector.load %arg1[%c0, %c0_0, %c0_1] : memref<1x8x128xf32, #tpu.memory_space<vmem>>, vector<1x8x128xf32>
    %1 = vector.shape_cast %0 : vector<1x8x128xf32> to vector<8x128xf32>
    %c0_2 = arith.constant 0 : index
    %c0_3 = arith.constant 0 : index
    %c0_4 = arith.constant 0 : index
    %2 = vector.load %arg2[%c0_2, %c0_3, %c0_4] : memref<1x3x128xf32, #tpu.memory_space<vmem>>, vector<1x3x128xf32>
    %3 = vector.shape_cast %2 : vector<1x3x128xf32> to vector<3x128xf32>
    %c0_5 = arith.constant 0 : index
    %c0_6 = arith.constant 0 : index
    %4 = vector.load %arg3[%c0_5, %c0_6] : memref<3x8xf32, #tpu.memory_space<vmem>>, vector<3x8xf32>
    %cst = arith.constant dense<0.000000e+00> : vector<3x128xf32>
    %5 = tpu.matmul %4, %1, %cst {dimension_numbers = #tpu.dot_dimension_numbers<[1], [0], [0], [1], [0, 0, 1, 1], [], []>} : vector<3x8xf32>, vector<8x128xf32>, vector<3x128xf32> -> vector<3x128xf32>
    %c0_7 = arith.constant 0 : index
    %c0_8 = arith.constant 0 : index
    %6 = vector.load %arg4[%c0_7, %c0_8] : memref<3x1xf32, #tpu.memory_space<vmem>>, vector<3x1xf32>
    %7 = vector.broadcast %6 : vector<3x1xf32> to vector<3x128xf32>
    %8 = arith.addf %5, %7 : vector<3x128xf32>
    %9 = tpu.transpose %8, [1, 0] : vector<3x128xf32> -> vector<128x3xf32>
    %cst_9 = arith.constant dense<0.000000e+00> : vector<3x3xf32>
    %10 = tpu.matmul %3, %9, %cst_9 {dimension_numbers = #tpu.dot_dimension_numbers<[1], [0], [0], [1], [0, 0, 1, 1], [], []>} : vector<3x128xf32>, vector<128x3xf32>, vector<3x3xf32> -> vector<3x3xf32>
    %11 = math.log %10 : vector<3x3xf32>
    %12 = vector.shape_cast %11 : vector<3x3xf32> to vector<1x3x3xf32>
    %cst_10 = arith.constant dense<0.000000e+00> : vector<1xf32>
    %13 = vector.multi_reduction <add>, %12, %cst_10 [1, 2] : vector<1x3x3xf32> to vector<1xf32>
    %14 = vector.shape_cast %13 : vector<1xf32> to vector<1x1x1xf32>
    %15 = vector.extract %14[0, 0, 0] : f32 from vector<1x1x1xf32>
    %cst_11 = arith.constant dense<0.000000e+00> : vector<128x128xf32>
    %16 = tpu.matmul %9, %3, %cst_11 {dimension_numbers = #tpu.dot_dimension_numbers<[1], [0], [0], [1], [0, 0, 1, 1], [], []>} : vector<128x3xf32>, vector<3x128xf32>, vector<128x128xf32> -> vector<128x128xf32>
    %17 = math.log %16 : vector<128x128xf32>
    %18 = vector.shape_cast %17 : vector<128x128xf32> to vector<1x128x128xf32>
    %cst_12 = arith.constant dense<0.000000e+00> : vector<1xf32>
    %19 = vector.multi_reduction <add>, %18, %cst_12 [1, 2] : vector<1x128x128xf32> to vector<1xf32>
    %20 = vector.shape_cast %19 : vector<1xf32> to vector<1x1x1xf32>
    %21 = vector.extract %20[0, 0, 0] : f32 from vector<1x1x1xf32>
    %22 = arith.addf %15, %21 : f32
    %cst_13 = arith.constant 0.000000e+00 : f32
    %23 = arith.subf %cst_13, %22 : f32
    %24 = vector.broadcast %23 : f32 to vector<1x8x128xf32>
    %c0_14 = arith.constant 0 : index
    %c0_15 = arith.constant 0 : index
    %c0_16 = arith.constant 0 : index
    %25 = vector.load %arg5[%c0_14, %c0_15, %c0_16] : memref<1x8x128xf32, #tpu.memory_space<vmem>>, vector<1x8x128xf32>
    tpu.vector_store %arg5[%c0_14, %c0_15, %c0_16], %24 {strides = array<i32>} : memref<1x8x128xf32, #tpu.memory_space<vmem>>, vector<1x8x128xf32>,
    return
  }
  func.func @transform_0(%arg0: i32) -> (i32, i32, i32) {
    %c0_i32 = arith.constant 0 : i32
    %c0_i32_0 = arith.constant 0 : i32
    %c0_i32_1 = arith.constant 0 : i32
    return %arg0, %c0_i32, %c0_i32_0 : i32, i32, i32
  }
  func.func @transform_1(%arg0: i32) -> (i32, i32, i32) {
    %c0_i32 = arith.constant 0 : i32
    %c0_i32_0 = arith.constant 0 : i32
    %c0_i32_1 = arith.constant 0 : i32
    return %arg0, %c0_i32, %c0_i32_0 : i32, i32, i32
  }
  func.func @transform_2(%arg0: i32) -> (i32, i32) {
    %c0_i32 = arith.constant 0 : i32
    %c0_i32_0 = arith.constant 0 : i32
    %c0_i32_1 = arith.constant 0 : i32
    return %c0_i32, %c0_i32_0 : i32, i32
  }
  func.func @transform_3(%arg0: i32) -> (i32, i32) {
    %c0_i32 = arith.constant 0 : i32
    %c0_i32_0 = arith.constant 0 : i32
    %c0_i32_1 = arith.constant 0 : i32
    return %c0_i32, %c0_i32_0 : i32, i32
  }
  func.func @transform_4(%arg0: i32) -> (i32, i32, i32) {
    %c0_i32 = arith.constant 0 : i32
    %c0_i32_0 = arith.constant 0 : i32
    %c0_i32_1 = arith.constant 0 : i32
    return %arg0, %c0_i32, %c0_i32_0 : i32, i32, i32
  }
}

</mosaic_0001>

<bundles_post_ra>
// kernel: tpu_custom_call.1
= control target key start
LH: loop header
LB: loop body
LE: loop exit
PB: predicated region body
PF: predicated region fallthrough
CT: control target
= control target key end

     0   :  { %9 = vsyncpa [#allocation3], 0  ;;  %s1310_s0 = inlined_call_operand.vmem [shape: f32[2,8,128], index: 0, kind: input, shape index: {}]   ;;  %s1311_s1 = inlined_call_operand.vmem [shape: f32[2,3,128], index: 1, kind: input, shape index: {}]   ;;  %s1312_s2 = inlined_call_operand.hbm [shape: f32[3,8], index: 2, kind: input, shape index: {}]   ;;  %s1313_s3 = inlined_call_operand.vmem [shape: f32[3,1], index: 3, kind: input, shape index: {}]   ;;  %s1314_s4 = inlined_call_operand.hbm [shape: f32[2,8,128], index: 4, kind: output, shape index: {}]  }
   0x1   :  { %10 = vsyncpa [#allocation4], 0 }
   0x2   :  { %12 = vsyncpa [#allocation4 + $0x1], 0  ;;  %s1153_s15 = smov 0   ;;  %s1155_s16 = smov 0  }
   0x3   :  { %s1157_s17 = smov 0   ;;  %s1159_s18 = smov 0  }
   0x4 LB: > { %s1174_s19 = sadd.s32 4294967295, %s1120_s18   ;;  %s776_s20 = sadd.s32 4294967294, %s1120_s18   ;;  %s1120_s18 = sphi %s1159_s18, %s1330_s18   ;;  %s1116_s17 = sphi %s1157_s17, %s1329_s17   ;;  %s1112_s16 = sphi %s1155_s16, %s1328_s16   ;;  %s1108_s15 = sphi %s1153_s15, %s1327_s15  }
   0x5   : > { %s1178_s21 = sadd.s32 1, %s1120_s18   ;;  %s119_s22 = sadd.s32 1, %s1116_s17 }
   0x6   : > { %s116_s23 = ssub.s32 %s1120_s18, %s1178_s21  ;;  %p129_p0 = scmp.ne.s32.totalorder %s1116_s17, %s1112_s16 }
   0x7   : > { %p117_p1 = scmp.eq.s32.totalorder %s116_s23, 0  ;;  %p130_p2 = scmp.eq.s32.totalorder %s1174_s19, 1 }
   0x8   : > { %p135_p3 = scmp.ne.s32.totalorder %s1112_s16, %s1108_s15  ;;  %p136_p4 = scmp.eq.s32.totalorder %s776_s20, 1 }
   0x9   : > { %s1189_s24 = scalar_select %p117_p1, %s1116_s17, %s119_s22  }
   0xa   : > { %p1191_p5 = por %p130_p2, %p129_p0  ;;  %p1195_p6 = por %p136_p4, %p135_p3 }
   0xb   : > { %p777_p7 = scmp.ge.s32.totalorder %s1120_s18, 1  ;;  %p143_p8 = scmp.lt.s32.totalorder %s1120_s18, 3 }
   0xc   : > { %s1318_s25 = scalar_select %p1191_p5, 1, 0 }
   0xd   : > { %s1319_s26 = scalar_select %p1195_p6, 1, 0 }
   0xe   : > { %p1315_p9 = scmp.eq.s32.totalorder %s1174_s19, 0  ;;  %p1202_p10 = pnand %p777_p7, %p143_p8 }
   0xf   : > { %s1122_s28 = smov [#allocation2]   ;;  %s1026_s7 = scalar_lea.hbm %s1312_s2, 64 }
  0x10   : > { %s1320_s27 = scalar_select %p1202_p10, 1, 0 }
  0x11   : > { %s156_s29 = sshll.u32 %s1122_s28, 4  ;;  %p943_p11 = pneg %p1202_p10  ;;  %s157_s29 = int_to_ptr.vmem [resolvable:$true] %s156_s29 }
  0x12   : > { %p1027_p13 = scmp.ne.s32.totalorder %s1312_s2, %s1026_s7  ;;  %p1033_p3 = scmp.lt.u32.totalorder %s1026_s7, %s1312_s2 }
  0x13   : > { %p1210_p12 = pnand %p1315_p9, %p943_p11 }
  0x15   : > { %p1028_p0 = pneg %p1210_p12 }
  0x17   : > { %p1029_p1 = pnand %p1028_p0, %p1027_p13 }
  0x19   : > { %p1030_p2 = pneg %p1029_p1 }
  0x1b   : > { %p1035_p4 = pnand %p1033_p3, %p1030_p2 }
  0x1d   : > { %1038 = shalt.err (!%p1035_p4)
}
  0x1e   : > { %s1039_s12 = scalar_lea.vmem %s157_s29, 64  ;;  %p1047_p9 = scmp.lt.s32.totalorder %s157_s29, %s157_s29 }
  0x1f   : > { %p1040_p7 = scmp.ne.s32.totalorder %s157_s29, %s1039_s12  ;;  %p1048_p6 = scmp.lt.s32.totalorder %s1039_s12, %s1039_s12 }
  0x21   : > { %p1042_p8 = pnand %p1040_p7, %p1028_p0  ;;  %p1049_p5 = por %p1048_p6, %p1047_p9 }
  0x23   : > { %p1043_p11 = pneg %p1042_p8 }
  0x25   : > { %p1050_p10 = pnand %p1049_p5, %p1043_p11 }
  0x27   : > { %1053 = shalt.err (!%p1050_p10)
}
  0x28   : > { %946 = dma.hbm_to_vmem [thread:$0]  (!%p1210_p12), %s1312_s2, 64, %s157_s29, [#allocation3]  }
  0x29   : > { %p1322_p13 = scmp.ne.s32.totalorder %s1320_s27, 0 }
  0x2a   : > { %p1323_p1 = scmp.eq.s32.totalorder (!%p1322_p13), %s1174_s19, 0 }
  0x2b   : > { %186 = sbr.rel (%p1322_p13) target bundleno = 920 (0x398), region = 36 }
  0x32   : > { %1099 = dma.done.wait (%p1323_p1), [#allocation3], 64   ;;  %p1324_p0 = pmov %p1323_p1 }
  0x33   : > { %p215_p6 = scmp.lt.s32.totalorder %s1174_s19, 1  ;;  %v1123_v0 = vmov 0.0   ;;  %vm1124_vm0 = vmmov 0   ;;  %v1125_v1 = vmov 0   ;;  %vm232_vm1 = vcmask 64512   ;;  %s212_s9 = sand.u32 1, %s1112_s16  }
  0x34   : > { %1101 = vsyncadd (%p1324_p0), [#allocation3], 4294967232  ;;  %843 = vmatprep.subr.mxu0 %v1123_v0  ;;  %845 = vmatprep.mubr.msk.f32.mxu0 %vm1124_vm0, %v1123_v0  ;;  %v225_v3 = vld [vmem:[#allocation2] sm:$0x7]  ;;  %vm470_vm2 = vcmask 1042432   ;;  %v1126_v10 = vmov 0.0|0.0  }
  0x35   : > { %s216_s20 = scalar_select %p215_p6, %s1174_s19, 1  ;;  %991 = vset.pattern.permute.xlu0 %v1125_v1  ;;  %880 = vmatprep.mubr.msk.f32.mxu1 %vm1124_vm0, %v1123_v0  ;;  %v226_v4 = vld [vmem:[%s1313_s3] sm:$0x7]  ;;  %vm421_vm3 = vcmask 23552   ;;  %vm410_vm4 = vcmask 18432  }
  0x36   : > { %229 = vperm.xlu0 %991, %v226_v4   ;;  %909 = vmatprep.subr.bf16.mxu1 %v1126_v10  ;;  %s782_s10 = sshll.u32 %s212_s9, 3  ;;  %s804_s13 = sshll.u32 %s1174_s19, 7 }
  0x37   : > { %s783_s22 = sshll.u32 %s216_s20, 3  ;;  %s784_s5 = sshll.u32 %s216_s20, 2 }
  0x38   : > { %s218_s28 = scalar_lea.vmem %s1310_s0, %s783_s22  ;;  %s222_s8 = scalar_lea.vmem %s1311_s1, %s784_s5 }
  0x39   : > { %v223_v2 = vld [vmem:[%s218_s28] sm:$0xff]  ;;  %s214_s20 = scalar_lea.vmem [#allocation5], %s782_s10  ;;  %s1268_s29 = scalar_lea.hbm %s1314_s4, %s804_s13 }
  0x3a   : > { %844 = vmatpush3.msra.mxu0 %v223_v2  ;;  %v224_v9 = vld [vmem:[%s222_s8] sm:$0x7]  ;;  %s693_s22 = sshll.u32 %s214_s20, 4  ;;  %s680_s30 = scalar_lea.sflag [#allocation4], %s212_s9  ;;  %s1270_s22 = int_to_ptr.vmem [resolvable:$true] %s693_s22 }
  0x3b   : > { %846 = vmatmul.mubr.msk.f32.vlgmr.msra.gmra.mrb[0].mxu0 %vm232_vm1, %v225_v3  ;;  %883 = vmatprep.subr.msk.mxu0 %vm470_vm2, %v224_v9  ;;  %s1054_s5 = scalar_lea.vmem %s1270_s22, 128  ;;  %p1325_p9 = scmp.ne.s32.totalorder %s1318_s25, 0 }
  0x3c   : > { %884 = vmatpush3.msk.msra.mxu0 %vm470_vm2, %v224_v9  ;;  %p1055_p5 = scmp.ne.s32.totalorder %s1270_s22, %s1054_s5  ;;  %s1127_s19 = smov [#allocation5]  }
  0x3d   : > { %s1058_s6 = sshll.u32 %s1127_s19, 4  ;;  %s1059_s6 = int_to_ptr.vmem [resolvable:$false] %s1058_s6 }
  0x3e   : > { %p1056_p10 = pnand %p1055_p5, %p1325_p9  ;;  %s1060_s7 = scalar_lea.vmem %s1059_s6, 256 }
  0x3f   : > { %p1061_p2 = scmp.lt.s32.totalorder %s1270_s22, %s1059_s6  ;;  %p1062_p3 = scmp.lt.s32.totalorder %s1060_s7, %s1054_s5 }
  0x40   : > { %p1057_p12 = pneg %p1056_p10 }
  0x41   : > { %p1063_p4 = por %p1062_p3, %p1061_p2 }
  0x43   : > { %p1064_p7 = pnand %p1063_p4, %p1057_p12 }
  0xb5   : > { %v230_v5 = vpop.permute.xlu0 %229 }
 0x10e   : > { %v302_v6 = vpop.f32.mrb[0].mxu0 }
 0x10f   : > { %v303_v7 = vadd.f32 %v302_v6, %v230_v5  ;;  %v847_v8 = vpop.f32.mrb[1].mxu0 }
 0x111   : > { %306 = vxpose.xlu0.b32.start.end [1/1] (short) %v303_v7, 128 }
 0x191   : > { %v322_v11 = vpop.trf.xlu0 }
 0x192   : > { %885 = vmatprep.mubr.msk.f32.mxu0 %vm421_vm3, %v322_v11 }
 0x195   : > { %v323_v12 = vpop.trf.xlu0 }
 0x196   : > { %886 = vmatmul.mubr.msk.f32.vlgmr.msra.gmra.mrb[2].mxu0 %vm421_vm3, %v323_v12  ;;  %v910_v13 = vpack.c.bf16 %v323_v12, %v322_v11 }
 0x198   : > { %911 = vmatpush3.bf16.msra.mxu1 %v910_v13 }
 0x199   : > { %v324_v14 = vpop.trf.xlu0  ;;  %912 = vmatprep.subr.bf16.mxu1 %v1126_v10 }
 0x19a   : > { %888 = vmatprep.mubr.msk.f32.mxu0 %vm421_vm3, %v324_v14 }
 0x19d   : > { %v325_v15 = vpop.trf.xlu0 }
 0x19e   : > { %v913_v16 = vpack.c.bf16 %v325_v15, %v324_v14  ;;  %889 = vmatmul.mubr.msk.f32.gmra.mrb[4].mxu0 %vm421_vm3, %v325_v15 }
 0x1a0   : > { %914 = vmatpush3.bf16.msra.mxu1 %v913_v16 }
 0x1a1   : > { %v326_v17 = vpop.trf.xlu0  ;;  %915 = vmatprep.subr.bf16.mxu1 %v1126_v10 }
 0x1a2   : > { %891 = vmatprep.mubr.msk.f32.mxu0 %vm421_vm3, %v326_v17 }
 0x1a5   : > { %v327_v18 = vpop.trf.xlu0 }
 0x1a6   : > { %v916_v19 = vpack.c.bf16 %v327_v18, %v326_v17  ;;  %892 = vmatmul.mubr.msk.f32.gmra.mrb[6].mxu0 %vm421_vm3, %v327_v18 }
 0x1a8   : > { %917 = vmatpush3.bf16.msra.mxu1 %v916_v19 }
 0x1a9   : > { %v328_v20 = vpop.trf.xlu0  ;;  %918 = vmatprep.subr.bf16.mxu1 %v1126_v10 }
 0x1aa   : > { %894 = vmatprep.mubr.msk.f32.mxu0 %vm421_vm3, %v328_v20 }
 0x1ad   : > { %v329_v21 = vpop.trf.xlu0 }
 0x1ae   : > { %v919_v22 = vpack.c.bf16 %v329_v21, %v328_v20  ;;  %895 = vmatmul.mubr.msk.f32.gmra.mrb[8].mxu0 %vm421_vm3, %v329_v21 }
 0x1b0   : > { %920 = vmatpush3.bf16.msra.mxu1 %v919_v22 }
 0x1b1   : > { %v330_v23 = vpop.trf.xlu0  ;;  %921 = vmatprep.subr.bf16.mxu1 %v1126_v10 }
 0x1b2   : > { %897 = vmatprep.mubr.msk.f32.mxu0 %vm421_vm3, %v330_v23 }
 0x1b5   : > { %v331_v24 = vpop.trf.xlu0 }
 0x1b6   : > { %v922_v25 = vpack.c.bf16 %v331_v24, %v330_v23  ;;  %898 = vmatmul.mubr.msk.f32.gmra.mrb[10].mxu0 %vm421_vm3, %v331_v24 }
 0x1b8   : > { %923 = vmatpush3.bf16.msra.mxu1 %v922_v25 }
 0x1b9   : > { %v332_v26 = vpop.trf.xlu0  ;;  %924 = vmatprep.subr.bf16.mxu1 %v1126_v10 }
 0x1ba   : > { %900 = vmatprep.mubr.msk.f32.mxu0 %vm421_vm3, %v332_v26 }
 0x1bd   : > { %v333_v27 = vpop.trf.xlu0 }
 0x1be   : > { %v925_v28 = vpack.c.bf16 %v333_v27, %v332_v26  ;;  %901 = vmatmul.mubr.msk.f32.gmra.mrb[12].mxu0 %vm421_vm3, %v333_v27 }
 0x1c0   : > { %926 = vmatpush3.bf16.msra.mxu1 %v925_v28 }
 0x1c1   : > { %v334_v29 = vpop.trf.xlu0  ;;  %927 = vmatprep.subr.bf16.mxu1 %v1126_v10 }
 0x1c2   : > { %903 = vmatprep.mubr.msk.f32.mxu0 %vm421_vm3, %v334_v29 }
 0x1c5   : > { %v335_v30 = vpop.trf.xlu0 }
 0x1c6   : > { %v928_v31 = vpack.c.bf16 %v335_v30, %v334_v29  ;;  %904 = vmatmul.mubr.msk.f32.gmra.mrb[14].mxu0 %vm421_vm3, %v335_v30 }
 0x1c8   : > { %929 = vmatpush3.bf16.msra.mxu1 %v928_v31 }
 0x1c9   : > { %v336_v32 = vpop.trf.xlu0  ;;  %930 = vmatprep.subr.bf16.mxu1 %v1126_v10 }
 0x1ca   : > { %906 = vmatprep.mubr.msk.f32.mxu0 %vm421_vm3, %v336_v32 }
 0x1cd   : > { %v337_v33 = vpop.trf.xlu0 }
 0x1ce   : > { %v931_v34 = vpack.c.bf16 %v337_v33, %v336_v32  ;;  %907 = vmatmul.mubr.msk.f32.gmra.mrb[16].mxu0 %vm421_vm3, %v337_v33 }
 0x1d0   : > { %932 = vmatpush3.bf16.msra.mxu1 %v931_v34 }
 0x1d3   : > { %881 = vmatmul.mubr.f32.vlgmr.msra.gmra.mrb[0].mxu1 %v224_v9 }
 0x269   : > { %v887_v35 = vpop.f32.mrb[2].mxu0 }
 0x26a   : > { %992 = vlog2.f32 %v887_v35  ;;  %v540_v36 = vpop.f32.mrb[3].mxu0 }
 0x26b   : > { %994 = vlog2.f32 %v540_v36 }
 0x271   : > { %v890_v37 = vpop.f32.mrb[4].mxu0 }
 0x272   : > { %996 = vlog2.f32 %v890_v37  ;;  %v550_v38 = vpop.f32.mrb[5].mxu0 }
 0x273   : > { %998 = vlog2.f32 %v550_v38 }
 0x274   : > { %v993_v39 = vpop.eup %992 }
 0x275   : > { %v995_v40 = vpop.eup %994  ;;  %v622_v41 = vmul.f32 0.6931472, %v993_v39 }
 0x276   : > { %v620_v42 = vmul.f32 0.6931472, %v995_v40 }
 0x278   : > { %v651_v43 = vadd.f32 %v622_v41, %v620_v42 }
 0x279   : > { %v893_v44 = vpop.f32.mrb[6].mxu0 }
 0x27a   : > { %1000 = vlog2.f32 %v893_v44  ;;  %v560_v45 = vpop.f32.mrb[7].mxu0 }
 0x27b   : > { %1002 = vlog2.f32 %v560_v45 }
 0x27c   : > { %v997_v46 = vpop.eup %996 }
 0x27d   : > { %v999_v47 = vpop.eup %998  ;;  %v626_v49 = vmul.f32 0.6931472, %v997_v46 }
 0x27e   : > { %v624_v48 = vmul.f32 0.6931472, %v999_v47 }
 0x280   : > { %v652_v50 = vadd.f32 %v651_v43, %v624_v48 }
 0x281   : > { %v896_v51 = vpop.f32.mrb[8].mxu0 }
 0x282   : > { %v653_v52 = vadd.f32 %v652_v50, %v626_v49  ;;  %1004 = vlog2.f32 %v896_v51  ;;  %v570_v53 = vpop.f32.mrb[9].mxu0 }
 0x283   : > { %1006 = vlog2.f32 %v570_v53 }
 0x284   : > { %v1001_v54 = vpop.eup %1000 }
 0x285   : > { %v1003_v55 = vpop.eup %1002  ;;  %v630_v57 = vmul.f32 0.6931472, %v1001_v54 }
 0x286   : > { %v628_v56 = vmul.f32 0.6931472, %v1003_v55 }
 0x288   : > { %v654_v58 = vadd.f32 %v653_v52, %v628_v56 }
 0x289   : > { %v899_v59 = vpop.f32.mrb[10].mxu0 }
 0x28a   : > { %v655_v60 = vadd.f32 %v654_v58, %v630_v57  ;;  %1008 = vlog2.f32 %v899_v59  ;;  %v580_v61 = vpop.f32.mrb[11].mxu0 }
 0x28b   : > { %1010 = vlog2.f32 %v580_v61 }
 0x28c   : > { %v1005_v62 = vpop.eup %1004 }
 0x28d   : > { %v1007_v63 = vpop.eup %1006  ;;  %v634_v1 = vmul.f32 0.6931472, %v1005_v62 }
 0x28e   : > { %v632_v0 = vmul.f32 0.6931472, %v1007_v63 }
 0x290   : > { %v656_v2 = vadd.f32 %v655_v60, %v632_v0 }
 0x291   : > { %v902_v3 = vpop.f32.mrb[12].mxu0 }
 0x292   : > { %v657_v4 = vadd.f32 %v656_v2, %v634_v1  ;;  %1012 = vlog2.f32 %v902_v3  ;;  %v590_v5 = vpop.f32.mrb[13].mxu0 }
 0x293   : > { %1014 = vlog2.f32 %v590_v5 }
 0x294   : > { %v1009_v6 = vpop.eup %1008 }
 0x295   : > { %v1011_v7 = vpop.eup %1010  ;;  %v638_v9 = vmul.f32 0.6931472, %v1009_v6 }
 0x296   : > { %v636_v8 = vmul.f32 0.6931472, %v1011_v7 }
 0x298   : > { %v658_v10 = vadd.f32 %v657_v4, %v636_v8 }
 0x299   : > { %v905_v11 = vpop.f32.mrb[14].mxu0 }
 0x29a   : > { %v659_v12 = vadd.f32 %v658_v10, %v638_v9  ;;  %1016 = vlog2.f32 %v905_v11  ;;  %v600_v13 = vpop.f32.mrb[15].mxu0 }
 0x29b   : > { %1018 = vlog2.f32 %v600_v13 }
 0x29c   : > { %v1013_v14 = vpop.eup %1012 }
 0x29d   : > { %v1015_v15 = vpop.eup %1014  ;;  %v642_v17 = vmul.f32 0.6931472, %v1013_v14 }
 0x29e   : > { %v640_v16 = vmul.f32 0.6931472, %v1015_v15 }
 0x2a0   : > { %v660_v18 = vadd.f32 %v659_v12, %v640_v16 }
 0x2a1   : > { %v908_v19 = vpop.f32.mrb[16].mxu0 }
 0x2a2   : > { %v661_v20 = vadd.f32 %v660_v18, %v642_v17  ;;  %1020 = vlog2.f32 %v908_v19  ;;  %v610_v21 = vpop.f32.mrb[17].mxu0 }
 0x2a3   : > { %1022 = vlog2.f32 %v610_v21 }
 0x2a4   : > { %v1017_v22 = vpop.eup %1016 }
 0x2a5   : > { %v1019_v23 = vpop.eup %1018  ;;  %v646_v27 = vmul.f32 0.6931472, %v1017_v22 }
 0x2a6   : > { %v644_v24 = vmul.f32 0.6931472, %v1019_v23  ;;  %v404_v25 = vpop.f32.mrb[0].mxu1 }
 0x2a7   : > { %1024 = vlog2.f32 %v404_v25  ;;  %v882_v26 = vpop.f32.mrb[1].mxu1 }
 0x2a8   : > { %v662_v28 = vadd.f32 %v661_v20, %v644_v24 }
 0x2aa   : > { %v663_v29 = vadd.f32 %v662_v28, %v646_v27 }
 0x2ac   : > { %v1021_v30 = vpop.eup %1020 }
 0x2ad   : > { %v1023_v31 = vpop.eup %1022  ;;  %v650_v33 = vmul.f32 0.6931472, %v1021_v30 }
 0x2ae   : > { %v648_v32 = vmul.f32 0.6931472, %v1023_v31 }
 0x2b0   : > { %v664_v34 = vadd.f32 %v663_v29, %v648_v32 }
 0x2b1   : > { %v1025_v35 = vpop.eup %1024 }
 0x2b2   : > { %v409_v36 = vmul.f32 0.6931472, %v1025_v35  ;;  %v665_v37 = vadd.f32 %v664_v34, %v650_v33 }
 0x2b4   : > { %v411_v38 = vsel %vm410_vm4, %v409_v36, 0.0 }
 0x2b5   : > { %412 = vadd.xlane.f32.xlu1 %v411_v38 }
 0x2b9   : > { %666 = vadd.xlane.f32.xlu1 %v665_v37 }
 0x342   : > { %v413_v39 = vpop.xlane.xlu1 %412 }
 0x343   : > { %v414_v40 = vrot.slane %v413_v39, 4 }
 0x345   : > { %v415_v41 = vadd.f32 %v414_v40, %v413_v39 }
 0x346   : > { %v667_v42 = vpop.xlane.xlu1 %666 }
 0x347   : > { %v416_v43 = vrot.slane %v415_v41, 2  ;;  %v668_v44 = vrot.slane %v667_v42, 4 }
 0x349   : > { %v669_v45 = vadd.f32 %v668_v44, %v667_v42  ;;  %v417_v46 = vadd.f32 %v416_v43, %v415_v41 }
 0x34b   : > { %v670_v47 = vrot.slane %v669_v45, 2  ;;  %v418_v48 = vrot.slane %v417_v46, 1 }
 0x34d   : > { %v671_v49 = vadd.f32 %v670_v47, %v669_v45  ;;  %v419_v50 = vadd.f32 %v418_v48, %v417_v46 }
 0x34f   : > { %933 = vpush %v419_v50  ;;  %v672_v51 = vrot.slane %v671_v49, 1 }
 0x351   : > { %v673_v52 = vadd.f32 %v672_v51, %v671_v49 }
 0x353   : > { %935 = vpush %v673_v52 }
 0x380   : > { %s934_s11 = spop %933 }
 0x384   : > { %s936_s12 = spop %935 }
 0x385   : > { %s675_s14 = sadd.f32 %s936_s12, %s934_s11 }
 0x387   : > { %s676_s23 = ssub.f32 0.0, %s675_s14 }
 0x389   : > { %v677_v53 = vstv %s676_s23 }
 0x38a   : > { %678 = vst [vmem:[%s214_s20] sm:$0xff] %v677_v53 }
 0x38b   : > { %1067 = shalt.err (!%p1064_p7)
}
 0x38c   : > { %s1068_s8 = scalar_lea.hbm %s1268_s29, 128  ;;  %s1072_s11 = scalar_lea.hbm %s1314_s4, 256 }
 0x38d   : > { %p1069_p8 = scmp.ne.s32.totalorder %s1268_s29, %s1068_s8  ;;  %p1073_p1 = scmp.lt.u32.totalorder %s1268_s29, %s1314_s4 }
 0x38e   : > { %p1074_p0 = scmp.lt.u32.totalorder %s1072_s11, %s1068_s8  ;;  %p1076_p5 = scmp.lt.u32.totalorder %s1068_s8, %s1268_s29 }
 0x38f   : > { %p1070_p11 = pnand %p1069_p8, %p1325_p9 }
 0x390   : > { %p1075_p6 = por %p1074_p0, %p1073_p1 }
 0x391   : > { %p1071_p13 = pneg %p1070_p11 }
 0x392   : > { %p1077_p10 = por %p1076_p5, %p1075_p6 }
 0x394   : > { %p1078_p12 = pnand %p1077_p10, %p1071_p13 }
 0x396   : > { %1081 = shalt.err (!%p1078_p12)
}
 0x397   : > { %941 = dma.vmem_to_hbm [thread:$0]  (%p1325_p9), %s1270_s22, 128, %s1268_s29, %s680_s30  }
 0x398 PF: > { %p953_p2 = scmp.ge.s32.totalorder %s1120_s18, 2  ;;  %s705_s14 = sand.u32 1, %s1108_s15  }
 0x399   : > { %p1326_p3 = scmp.ne.s32.totalorder %s1319_s26, 0  ;;  %s706_s20 = scalar_lea.sflag [#allocation4], %s705_s14 }
 0x39b   : > { %p948_p4 = pnand %p953_p2, %p1326_p3 }
 0x39d   : > { %1103 = dma.done.wait (!%p948_p4), %s706_s20, 128  }
 0x39e   : > { %1105 = vsyncadd (!%p948_p4), %s706_s20, 4294967168  ;;  %p15_p7 = scmp.ge.s32.totalorder %s1178_s21, 4   ;;  %s1327_s15 = smov %s1112_s16 }
 0x39f   : > { %s1328_s16 = smov %s1116_s17  ;;  %s1329_s17 = smov %s1189_s24 }
 0x3a0   : > { %s1330_s18 = smov %s1178_s21  ;;  %17 = sbr.rel (!%p15_p7) target bundleno = 4 (0x4), region = 79 }
 0x3a7   :  { %711 = vsyncpa [#allocation3], 1 }
 0x3a8   :  { %713 = vsyncpa [#allocation3 + $0x1], 1 }
 0x3a9   :  { %714 = vsyncpa [#allocation4], 1 }
 0x3aa   :  { %716 = vsyncpa [#allocation4 + $0x1], 1 }

</bundles_post_ra>
